<compile_context>
chip_gen: v7x
topology: tpu7x:2x2x1
jax: 0.10.0
libtpu: 0.0.40
codegen_flags: <defaults>
</compile_context>

<pallas_src>
import functools

import jax
import jax.numpy as jnp
from jax.experimental import pallas as pl
from jax.experimental.pallas import tpu as pltpu


def _attention_gate_kernel(wg_ref, ws_ref, b1_ref, wo_ref, bo_ref,
                           g_ref, s_ref, o_ref):
    """One (sample, pixel-row-tile) block.

    g_ref: (Cg, R, L)   s_ref / o_ref: (Cs, R, L)   -- lane-dense channel slabs
    wg_ref: (outc, Cg), ws_ref: (outc, Cs), wo_ref: (outc, outc)   -- SMEM
    b1_ref: (outc,)  (= bg_folded + bs_folded),  bo_ref: (outc,)   -- SMEM
    """
    outc, cg = wg_ref.shape
    _, cs = ws_ref.shape
    slab = g_ref.shape[1:]                       # (R, L)

    g = [g_ref[c].astype(jnp.float32) for c in range(cg)]
    s = [s_ref[c].astype(jnp.float32) for c in range(cs)]

    # hidden = relu(Conv1x1_g(g) + Conv1x1_s(s))  -- unrolled VPU FMAs
    a = []
    for o in range(outc):
        acc = jnp.full(slab, b1_ref[o], jnp.float32)
        for c in range(cg):
            acc = acc + wg_ref[o, c] * g[c]
        for c in range(cs):
            acc = acc + ws_ref[o, c] * s[c]
        a.append(jnp.maximum(acc, 0.0))

    # out = sigmoid(Conv1x1_o(hidden)) * s
    for o in range(outc):
        acc = jnp.full(slab, bo_ref[o], jnp.float32)
        for k in range(outc):
            acc = acc + wo_ref[o, k] * a[k]
        att = jax.nn.sigmoid(acc)
        o_ref[o] = (att * s[o]).astype(o_ref.dtype)


def _fold_bn(w, b, gamma, beta, mean, var, eps=1e-5):
    """Fold eval-mode BatchNorm2d into a 1x1 conv.  w: (Cout, Cin), b: (Cout,)."""
    scale = gamma / jnp.sqrt(var + eps)
    return w * scale[:, None], (b - mean) * scale + beta


def _pick_tile_rows(rows_total, max_rows):
    """Largest row-tile <= max_rows that divides rows_total (multiple of 8)."""
    if rows_total <= max_rows:
        return rows_total
    r = (max_rows // 8) * 8
    while r >= 8:
        if rows_total % r == 0:
            return r
        r -= 8
    return rows_total  # TODO(synk): no aligned divisor; falls back to one big block


@functools.partial(jax.jit, static_argnames=("max_rows",))
def attention_gate_forward(g, s, params, max_rows=512):
    """g: (N, Cg, H, W), s: (N, Cs, H, W) in NCHW.  Returns (N, Cs, H, W)."""
    N, Cg, H, W = g.shape
    Ns, Cs, Hs, Ws2 = s.shape
    assert (N, H, W) == (Ns, Hs, Ws2)
    outc = params["wg"].shape[0]
    assert outc == Cs, "broadcast of att * s requires outc == inc[1]"

    HW = H * W
    if HW % 128 == 0:                    # lane-dense slabs: (rows, 128)
        lanes, rows_total = 128, HW // 128
    else:                                # fallback: whole HW on the lane axis
        lanes, rows_total = HW, 1
    tile_rows = _pick_tile_rows(rows_total, max_rows)
    grid = (N, rows_total // tile_rows)

    # Fold BN into the two input convs; combine their biases (glue, plain JAX).
    wg_f, bg_f = _fold_bn(params["wg"], params["bg"], params["g_gamma"],
                          params["g_beta"], params["g_mean"], params["g_var"])
    ws_f, bs_f = _fold_bn(params["ws"], params["bs"], params["s_gamma"],
                          params["s_beta"], params["s_mean"], params["s_var"])
    b1 = (bg_f + bs_f).astype(jnp.float32)
    wg_f = wg_f.astype(jnp.float32)
    ws_f = ws_f.astype(jnp.float32)
    wo = params["wo"].astype(jnp.float32)
    bo = params["bo"].astype(jnp.float32)

    # Free, contiguous reshape of NCHW: (N, C, HW//lanes, lanes).
    g4 = g.reshape(N, Cg, rows_total, lanes)
    s4 = s.reshape(N, Cs, rows_total, lanes)

    smem = pl.BlockSpec(memory_space=pltpu.MemorySpace.SMEM)

    def pix_spec(C):
        return pl.BlockSpec((pl.Squeezed(), C, tile_rows, lanes),
                            lambda n, r: (n, 0, r, 0))

    out4 = pl.pallas_call(
        _attention_gate_kernel,
        out_shape=jax.ShapeDtypeStruct((N, Cs, rows_total, lanes), s.dtype),
        grid_spec=pltpu.PrefetchScalarGridSpec(
            num_scalar_prefetch=0,
            grid=grid,
            in_specs=[smem, smem, smem, smem, smem,   # wg, ws, b1, wo, bo
                      pix_spec(Cg),                   # g tile
                      pix_spec(Cs)],                  # s tile
            out_specs=pix_spec(Cs),
        ),
        compiler_params=pltpu.CompilerParams(
            dimension_semantics=("parallel", "parallel"),
            vmem_limit_bytes=32 * 1024 * 1024),
    )(wg_f, ws_f, b1, wo, bo, g4, s4)

    return out4.reshape(N, Cs, H, W)


def _reference(g, s, params):
    """Pure-JAX reference mirroring the PyTorch forward (eval-mode BN)."""
    wg_f, bg_f = _fold_bn(params["wg"], params["bg"], params["g_gamma"],
                          params["g_beta"], params["g_mean"], params["g_var"])
    ws_f, bs_f = _fold_bn(params["ws"], params["bs"], params["s_gamma"],
                          params["s_beta"], params["s_mean"], params["s_var"])
    conv1x1 = lambda x, w, b: (jnp.einsum("nchw,oc->nohw", x, w)
                               + b[None, :, None, None])
    a = jax.nn.relu(conv1x1(g, wg_f, bg_f) + conv1x1(s, ws_f, bs_f))
    att = jax.nn.sigmoid(conv1x1(a, params["wo"], params["bo"]))
    return att * s


def make_params(key, inc, outc):
    ks = jax.random.split(key, 6)
    cg, cs = inc
    return {
        # Conv2d 1x1 weights stored as (Cout, Cin); biases (Cout,)
        "wg": 0.1 * jax.random.normal(ks[0], (outc, cg), jnp.float32),
        "bg": 0.1 * jax.random.normal(ks[1], (outc,), jnp.float32),
        "ws": 0.1 * jax.random.normal(ks[2], (outc, cs), jnp.float32),
        "bs": 0.1 * jax.random.normal(ks[3], (outc,), jnp.float32),
        "wo": 0.1 * jax.random.normal(ks[4], (outc, outc), jnp.float32),
        "bo": 0.1 * jax.random.normal(ks[5], (outc,), jnp.float32),
        # BatchNorm2d params (eval mode running stats)
        "g_gamma": jnp.ones((outc,), jnp.float32),
        "g_beta": jnp.zeros((outc,), jnp.float32),
        "g_mean": 0.01 * jnp.arange(outc, dtype=jnp.float32),
        "g_var": jnp.ones((outc,), jnp.float32)
                 + 0.05 * jnp.arange(outc, dtype=jnp.float32),
        "s_gamma": 1.0 + 0.02 * jnp.arange(outc, dtype=jnp.float32),
        "s_beta": 0.03 * jnp.arange(outc, dtype=jnp.float32),
        "s_mean": jnp.zeros((outc,), jnp.float32),
        "s_var": jnp.ones((outc,), jnp.float32),
    }


if __name__ == "__main__":
    key = jax.random.PRNGKey(0)
    k_g, k_s, k_p = jax.random.split(key, 3)

    inc = (6, 4)     # (channels of g, channels of s)
    outc = 4         # must equal inc[1] so att * s broadcasts like PyTorch
    N, H, W = 2, 16, 16

    g = jax.random.normal(k_g, (N, inc[0], H, W), jnp.float32)
    s = jax.random.normal(k_s, (N, inc[1], H, W), jnp.float32)
    params = make_params(k_p, inc, outc)

    out = attention_gate_forward(g, s, params)
    out = jax.block_until_ready(out)

    ref = _reference(g, s, params)
    assert out.shape == (N, inc[1], H, W)
    assert jnp.allclose(out, ref, rtol=1e-4, atol=1e-5), "mismatch vs reference"

    print("KERNEL_OK")
</pallas_src>

<mosaic_0001>
module attributes {stable_mosaic.version = 11 : i64} {
  func.func @_attention_gate_kernel(%arg0: i32, %arg1: i32, %arg2: memref<4x6xf32, #tpu.memory_space<smem>>, %arg3: memref<4x4xf32, #tpu.memory_space<smem>>, %arg4: memref<4xf32, #tpu.memory_space<smem>>, %arg5: memref<4x4xf32, #tpu.memory_space<smem>>, %arg6: memref<4xf32, #tpu.memory_space<smem>>, %arg7: memref<1x6x2x128xf32, #tpu.memory_space<vmem>>, %arg8: memref<1x4x2x128xf32, #tpu.memory_space<vmem>>, %arg9: memref<1x4x2x128xf32, #tpu.memory_space<vmem>>) attributes {dimension_semantics = [#tpu.dimension_semantics<parallel>, #tpu.dimension_semantics<parallel>], iteration_bounds = array<i64: 2, 1>, scalar_prefetch = 0 : i64, scratch_operands = 0 : i64, tpu.core_type = #tpu.core_type<tc>, window_params = [{transform_indices = @transform_0, window_bounds = array<i64: 4, 6>}, {transform_indices = @transform_1, window_bounds = array<i64: 4, 4>}, {transform_indices = @transform_2, window_bounds = array<i64: 4>}, {transform_indices = @transform_3, window_bounds = array<i64: 4, 4>}, {transform_indices = @transform_4, window_bounds = array<i64: 4>}, {transform_indices = @transform_5, window_bounds = array<i64: 1, 6, 2, 128>}, {transform_indices = @transform_6, window_bounds = array<i64: 1, 4, 2, 128>}, {transform_indices = @transform_7, window_bounds = array<i64: 1, 4, 2, 128>}]} {
    %c0 = arith.constant 0 : index
    %c0_0 = arith.constant 0 : index
    %c0_1 = arith.constant 0 : index
    %c0_2 = arith.constant 0 : index
    %0 = vector.load %arg7[%c0, %c0_0, %c0_1, %c0_2] : memref<1x6x2x128xf32, #tpu.memory_space<vmem>>, vector<1x1x2x128xf32>
    %1 = vector.shape_cast %0 : vector<1x1x2x128xf32> to vector<2x128xf32>
    %c0_3 = arith.constant 0 : index
    %c1 = arith.constant 1 : index
    %c0_4 = arith.constant 0 : index
    %c0_5 = arith.constant 0 : index
    %2 = vector.load %arg7[%c0_3, %c1, %c0_4, %c0_5] : memref<1x6x2x128xf32, #tpu.memory_space<vmem>>, vector<1x1x2x128xf32>
    %3 = vector.shape_cast %2 : vector<1x1x2x128xf32> to vector<2x128xf32>
    %c0_6 = arith.constant 0 : index
    %c2 = arith.constant 2 : index
    %c0_7 = arith.constant 0 : index
    %c0_8 = arith.constant 0 : index
    %4 = vector.load %arg7[%c0_6, %c2, %c0_7, %c0_8] : memref<1x6x2x128xf32, #tpu.memory_space<vmem>>, vector<1x1x2x128xf32>
    %5 = vector.shape_cast %4 : vector<1x1x2x128xf32> to vector<2x128xf32>
    %c0_9 = arith.constant 0 : index
    %c3 = arith.constant 3 : index
    %c0_10 = arith.constant 0 : index
    %c0_11 = arith.constant 0 : index
    %6 = vector.load %arg7[%c0_9, %c3, %c0_10, %c0_11] : memref<1x6x2x128xf32, #tpu.memory_space<vmem>>, vector<1x1x2x128xf32>
    %7 = vector.shape_cast %6 : vector<1x1x2x128xf32> to vector<2x128xf32>
    %c0_12 = arith.constant 0 : index
    %c4 = arith.constant 4 : index
    %c0_13 = arith.constant 0 : index
    %c0_14 = arith.constant 0 : index
    %8 = vector.load %arg7[%c0_12, %c4, %c0_13, %c0_14] : memref<1x6x2x128xf32, #tpu.memory_space<vmem>>, vector<1x1x2x128xf32>
    %9 = vector.shape_cast %8 : vector<1x1x2x128xf32> to vector<2x128xf32>
    %c0_15 = arith.constant 0 : index
    %c5 = arith.constant 5 : index
    %c0_16 = arith.constant 0 : index
    %c0_17 = arith.constant 0 : index
    %10 = vector.load %arg7[%c0_15, %c5, %c0_16, %c0_17] : memref<1x6x2x128xf32, #tpu.memory_space<vmem>>, vector<1x1x2x128xf32>
    %11 = vector.shape_cast %10 : vector<1x1x2x128xf32> to vector<2x128xf32>
    %c0_18 = arith.constant 0 : index
    %c0_19 = arith.constant 0 : index
    %c0_20 = arith.constant 0 : index
    %c0_21 = arith.constant 0 : index
    %12 = vector.load %arg8[%c0_18, %c0_19, %c0_20, %c0_21] : memref<1x4x2x128xf32, #tpu.memory_space<vmem>>, vector<1x1x2x128xf32>
    %13 = vector.shape_cast %12 : vector<1x1x2x128xf32> to vector<2x128xf32>
    %c0_22 = arith.constant 0 : index
    %c1_23 = arith.constant 1 : index
    %c0_24 = arith.constant 0 : index
    %c0_25 = arith.constant 0 : index
    %14 = vector.load %arg8[%c0_22, %c1_23, %c0_24, %c0_25] : memref<1x4x2x128xf32, #tpu.memory_space<vmem>>, vector<1x1x2x128xf32>
    %15 = vector.shape_cast %14 : vector<1x1x2x128xf32> to vector<2x128xf32>
    %c0_26 = arith.constant 0 : index
    %c2_27 = arith.constant 2 : index
    %c0_28 = arith.constant 0 : index
    %c0_29 = arith.constant 0 : index
    %16 = vector.load %arg8[%c0_26, %c2_27, %c0_28, %c0_29] : memref<1x4x2x128xf32, #tpu.memory_space<vmem>>, vector<1x1x2x128xf32>
    %17 = vector.shape_cast %16 : vector<1x1x2x128xf32> to vector<2x128xf32>
    %c0_30 = arith.constant 0 : index
    %c3_31 = arith.constant 3 : index
    %c0_32 = arith.constant 0 : index
    %c0_33 = arith.constant 0 : index
    %18 = vector.load %arg8[%c0_30, %c3_31, %c0_32, %c0_33] : memref<1x4x2x128xf32, #tpu.memory_space<vmem>>, vector<1x1x2x128xf32>
    %19 = vector.shape_cast %18 : vector<1x1x2x128xf32> to vector<2x128xf32>
    %c0_34 = arith.constant 0 : index
    %20 = memref.load %arg4[%c0_34] : memref<4xf32, #tpu.memory_space<smem>>
    %21 = vector.broadcast %20 : f32 to vector<2x128xf32>
    %c0_35 = arith.constant 0 : index
    %c0_36 = arith.constant 0 : index
    %22 = memref.load %arg2[%c0_35, %c0_36] : memref<4x6xf32, #tpu.memory_space<smem>>
    %23 = vector.broadcast %22 : f32 to vector<2x128xf32>
    %24 = arith.mulf %23, %1 : vector<2x128xf32>
    %25 = arith.addf %21, %24 : vector<2x128xf32>
    %c0_37 = arith.constant 0 : index
    %c1_38 = arith.constant 1 : index
    %26 = memref.load %arg2[%c0_37, %c1_38] : memref<4x6xf32, #tpu.memory_space<smem>>
    %27 = vector.broadcast %26 : f32 to vector<2x128xf32>
    %28 = arith.mulf %27, %3 : vector<2x128xf32>
    %29 = arith.addf %25, %28 : vector<2x128xf32>
    %c0_39 = arith.constant 0 : index
    %c2_40 = arith.constant 2 : index
    %30 = memref.load %arg2[%c0_39, %c2_40] : memref<4x6xf32, #tpu.memory_space<smem>>
    %31 = vector.broadcast %30 : f32 to vector<2x128xf32>
    %32 = arith.mulf %31, %5 : vector<2x128xf32>
    %33 = arith.addf %29, %32 : vector<2x128xf32>
    %c0_41 = arith.constant 0 : index
    %c3_42 = arith.constant 3 : index
    %34 = memref.load %arg2[%c0_41, %c3_42] : memref<4x6xf32, #tpu.memory_space<smem>>
    %35 = vector.broadcast %34 : f32 to vector<2x128xf32>
    %36 = arith.mulf %35, %7 : vector<2x128xf32>
    %37 = arith.addf %33, %36 : vector<2x128xf32>
    %c0_43 = arith.constant 0 : index
    %c4_44 = arith.constant 4 : index
    %38 = memref.load %arg2[%c0_43, %c4_44] : memref<4x6xf32, #tpu.memory_space<smem>>
    %39 = vector.broadcast %38 : f32 to vector<2x128xf32>
    %40 = arith.mulf %39, %9 : vector<2x128xf32>
    %41 = arith.addf %37, %40 : vector<2x128xf32>
    %c0_45 = arith.constant 0 : index
    %c5_46 = arith.constant 5 : index
    %42 = memref.load %arg2[%c0_45, %c5_46] : memref<4x6xf32, #tpu.memory_space<smem>>
    %43 = vector.broadcast %42 : f32 to vector<2x128xf32>
    %44 = arith.mulf %43, %11 : vector<2x128xf32>
    %45 = arith.addf %41, %44 : vector<2x128xf32>
    %c0_47 = arith.constant 0 : index
    %c0_48 = arith.constant 0 : index
    %46 = memref.load %arg3[%c0_47, %c0_48] : memref<4x4xf32, #tpu.memory_space<smem>>
    %47 = vector.broadcast %46 : f32 to vector<2x128xf32>
    %48 = arith.mulf %47, %13 : vector<2x128xf32>
    %49 = arith.addf %45, %48 : vector<2x128xf32>
    %c0_49 = arith.constant 0 : index
    %c1_50 = arith.constant 1 : index
    %50 = memref.load %arg3[%c0_49, %c1_50] : memref<4x4xf32, #tpu.memory_space<smem>>
    %51 = vector.broadcast %50 : f32 to vector<2x128xf32>
    %52 = arith.mulf %51, %15 : vector<2x128xf32>
    %53 = arith.addf %49, %52 : vector<2x128xf32>
    %c0_51 = arith.constant 0 : index
    %c2_52 = arith.constant 2 : index
    %54 = memref.load %arg3[%c0_51, %c2_52] : memref<4x4xf32, #tpu.memory_space<smem>>
    %55 = vector.broadcast %54 : f32 to vector<2x128xf32>
    %56 = arith.mulf %55, %17 : vector<2x128xf32>
    %57 = arith.addf %53, %56 : vector<2x128xf32>
    %c0_53 = arith.constant 0 : index
    %c3_54 = arith.constant 3 : index
    %58 = memref.load %arg3[%c0_53, %c3_54] : memref<4x4xf32, #tpu.memory_space<smem>>
    %59 = vector.broadcast %58 : f32 to vector<2x128xf32>
    %60 = arith.mulf %59, %19 : vector<2x128xf32>
    %61 = arith.addf %57, %60 : vector<2x128xf32>
    %cst = arith.constant 0.000000e+00 : f32
    %62 = vector.broadcast %cst : f32 to vector<2x128xf32>
    %63 = arith.maximumf %61, %62 : vector<2x128xf32>
    %c1_55 = arith.constant 1 : index
    %64 = memref.load %arg4[%c1_55] : memref<4xf32, #tpu.memory_space<smem>>
    %65 = vector.broadcast %64 : f32 to vector<2x128xf32>
    %c1_56 = arith.constant 1 : index
    %c0_57 = arith.constant 0 : index
    %66 = memref.load %arg2[%c1_56, %c0_57] : memref<4x6xf32, #tpu.memory_space<smem>>
    %67 = vector.broadcast %66 : f32 to vector<2x128xf32>
    %68 = arith.mulf %67, %1 : vector<2x128xf32>
    %69 = arith.addf %65, %68 : vector<2x128xf32>
    %c1_58 = arith.constant 1 : index
    %c1_59 = arith.constant 1 : index
    %70 = memref.load %arg2[%c1_58, %c1_59] : memref<4x6xf32, #tpu.memory_space<smem>>
    %71 = vector.broadcast %70 : f32 to vector<2x128xf32>
    %72 = arith.mulf %71, %3 : vector<2x128xf32>
    %73 = arith.addf %69, %72 : vector<2x128xf32>
    %c1_60 = arith.constant 1 : index
    %c2_61 = arith.constant 2 : index
    %74 = memref.load %arg2[%c1_60, %c2_61] : memref<4x6xf32, #tpu.memory_space<smem>>
    %75 = vector.broadcast %74 : f32 to vector<2x128xf32>
    %76 = arith.mulf %75, %5 : vector<2x128xf32>
    %77 = arith.addf %73, %76 : vector<2x128xf32>
    %c1_62 = arith.constant 1 : index
    %c3_63 = arith.constant 3 : index
    %78 = memref.load %arg2[%c1_62, %c3_63] : memref<4x6xf32, #tpu.memory_space<smem>>
    %79 = vector.broadcast %78 : f32 to vector<2x128xf32>
    %80 = arith.mulf %79, %7 : vector<2x128xf32>
    %81 = arith.addf %77, %80 : vector<2x128xf32>
    %c1_64 = arith.constant 1 : index
    %c4_65 = arith.constant 4 : index
    %82 = memref.load %arg2[%c1_64, %c4_65] : memref<4x6xf32, #tpu.memory_space<smem>>
    %83 = vector.broadcast %82 : f32 to vector<2x128xf32>
    %84 = arith.mulf %83, %9 : vector<2x128xf32>
    %85 = arith.addf %81, %84 : vector<2x128xf32>
    %c1_66 = arith.constant 1 : index
    %c5_67 = arith.constant 5 : index
    %86 = memref.load %arg2[%c1_66, %c5_67] : memref<4x6xf32, #tpu.memory_space<smem>>
    %87 = vector.broadcast %86 : f32 to vector<2x128xf32>
    %88 = arith.mulf %87, %11 : vector<2x128xf32>
    %89 = arith.addf %85, %88 : vector<2x128xf32>
    %c1_68 = arith.constant 1 : index
    %c0_69 = arith.constant 0 : index
    %90 = memref.load %arg3[%c1_68, %c0_69] : memref<4x4xf32, #tpu.memory_space<smem>>
    %91 = vector.broadcast %90 : f32 to vector<2x128xf32>
    %92 = arith.mulf %91, %13 : vector<2x128xf32>
    %93 = arith.addf %89, %92 : vector<2x128xf32>
    %c1_70 = arith.constant 1 : index
    %c1_71 = arith.constant 1 : index
    %94 = memref.load %arg3[%c1_70, %c1_71] : memref<4x4xf32, #tpu.memory_space<smem>>
    %95 = vector.broadcast %94 : f32 to vector<2x128xf32>
    %96 = arith.mulf %95, %15 : vector<2x128xf32>
    %97 = arith.addf %93, %96 : vector<2x128xf32>
    %c1_72 = arith.constant 1 : index
    %c2_73 = arith.constant 2 : index
    %98 = memref.load %arg3[%c1_72, %c2_73] : memref<4x4xf32, #tpu.memory_space<smem>>
    %99 = vector.broadcast %98 : f32 to vector<2x128xf32>
    %100 = arith.mulf %99, %17 : vector<2x128xf32>
    %101 = arith.addf %97, %100 : vector<2x128xf32>
    %c1_74 = arith.constant 1 : index
    %c3_75 = arith.constant 3 : index
    %102 = memref.load %arg3[%c1_74, %c3_75] : memref<4x4xf32, #tpu.memory_space<smem>>
    %103 = vector.broadcast %102 : f32 to vector<2x128xf32>
    %104 = arith.mulf %103, %19 : vector<2x128xf32>
    %105 = arith.addf %101, %104 : vector<2x128xf32>
    %cst_76 = arith.constant 0.000000e+00 : f32
    %106 = vector.broadcast %cst_76 : f32 to vector<2x128xf32>
    %107 = arith.maximumf %105, %106 : vector<2x128xf32>
    %c2_77 = arith.constant 2 : index
    %108 = memref.load %arg4[%c2_77] : memref<4xf32, #tpu.memory_space<smem>>
    %109 = vector.broadcast %108 : f32 to vector<2x128xf32>
    %c2_78 = arith.constant 2 : index
    %c0_79 = arith.constant 0 : index
    %110 = memref.load %arg2[%c2_78, %c0_79] : memref<4x6xf32, #tpu.memory_space<smem>>
    %111 = vector.broadcast %110 : f32 to vector<2x128xf32>
    %112 = arith.mulf %111, %1 : vector<2x128xf32>
    %113 = arith.addf %109, %112 : vector<2x128xf32>
    %c2_80 = arith.constant 2 : index
    %c1_81 = arith.constant 1 : index
    %114 = memref.load %arg2[%c2_80, %c1_81] : memref<4x6xf32, #tpu.memory_space<smem>>
    %115 = vector.broadcast %114 : f32 to vector<2x128xf32>
    %116 = arith.mulf %115, %3 : vector<2x128xf32>
    %117 = arith.addf %113, %116 : vector<2x128xf32>
    %c2_82 = arith.constant 2 : index
    %c2_83 = arith.constant 2 : index
    %118 = memref.load %arg2[%c2_82, %c2_83] : memref<4x6xf32, #tpu.memory_space<smem>>
    %119 = vector.broadcast %118 : f32 to vector<2x128xf32>
    %120 = arith.mulf %119, %5 : vector<2x128xf32>
    %121 = arith.addf %117, %120 : vector<2x128xf32>
    %c2_84 = arith.constant 2 : index
    %c3_85 = arith.constant 3 : index
    %122 = memref.load %arg2[%c2_84, %c3_85] : memref<4x6xf32, #tpu.memory_space<smem>>
    %123 = vector.broadcast %122 : f32 to vector<2x128xf32>
    %124 = arith.mulf %123, %7 : vector<2x128xf32>
    %125 = arith.addf %121, %124 : vector<2x128xf32>
    %c2_86 = arith.constant 2 : index
    %c4_87 = arith.constant 4 : index
    %126 = memref.load %arg2[%c2_86, %c4_87] : memref<4x6xf32, #tpu.memory_space<smem>>
    %127 = vector.broadcast %126 : f32 to vector<2x128xf32>
    %128 = arith.mulf %127, %9 : vector<2x128xf32>
    %129 = arith.addf %125, %128 : vector<2x128xf32>
    %c2_88 = arith.constant 2 : index
    %c5_89 = arith.constant 5 : index
    %130 = memref.load %arg2[%c2_88, %c5_89] : memref<4x6xf32, #tpu.memory_space<smem>>
    %131 = vector.broadcast %130 : f32 to vector<2x128xf32>
    %132 = arith.mulf %131, %11 : vector<2x128xf32>
    %133 = arith.addf %129, %132 : vector<2x128xf32>
    %c2_90 = arith.constant 2 : index
    %c0_91 = arith.constant 0 : index
    %134 = memref.load %arg3[%c2_90, %c0_91] : memref<4x4xf32, #tpu.memory_space<smem>>
    %135 = vector.broadcast %134 : f32 to vector<2x128xf32>
    %136 = arith.mulf %135, %13 : vector<2x128xf32>
    %137 = arith.addf %133, %136 : vector<2x128xf32>
    %c2_92 = arith.constant 2 : index
    %c1_93 = arith.constant 1 : index
    %138 = memref.load %arg3[%c2_92, %c1_93] : memref<4x4xf32, #tpu.memory_space<smem>>
    %139 = vector.broadcast %138 : f32 to vector<2x128xf32>
    %140 = arith.mulf %139, %15 : vector<2x128xf32>
    %141 = arith.addf %137, %140 : vector<2x128xf32>
    %c2_94 = arith.constant 2 : index
    %c2_95 = arith.constant 2 : index
    %142 = memref.load %arg3[%c2_94, %c2_95] : memref<4x4xf32, #tpu.memory_space<smem>>
    %143 = vector.broadcast %142 : f32 to vector<2x128xf32>
    %144 = arith.mulf %143, %17 : vector<2x128xf32>
    %145 = arith.addf %141, %144 : vector<2x128xf32>
    %c2_96 = arith.constant 2 : index
    %c3_97 = arith.constant 3 : index
    %146 = memref.load %arg3[%c2_96, %c3_97] : memref<4x4xf32, #tpu.memory_space<smem>>
    %147 = vector.broadcast %146 : f32 to vector<2x128xf32>
    %148 = arith.mulf %147, %19 : vector<2x128xf32>
    %149 = arith.addf %145, %148 : vector<2x128xf32>
    %cst_98 = arith.constant 0.000000e+00 : f32
    %150 = vector.broadcast %cst_98 : f32 to vector<2x128xf32>
    %151 = arith.maximumf %149, %150 : vector<2x128xf32>
    %c3_99 = arith.constant 3 : index
    %152 = memref.load %arg4[%c3_99] : memref<4xf32, #tpu.memory_space<smem>>
    %153 = vector.broadcast %152 : f32 to vector<2x128xf32>
    %c3_100 = arith.constant 3 : index
    %c0_101 = arith.constant 0 : index
    %154 = memref.load %arg2[%c3_100, %c0_101] : memref<4x6xf32, #tpu.memory_space<smem>>
    %155 = vector.broadcast %154 : f32 to vector<2x128xf32>
    %156 = arith.mulf %155, %1 : vector<2x128xf32>
    %157 = arith.addf %153, %156 : vector<2x128xf32>
    %c3_102 = arith.constant 3 : index
    %c1_103 = arith.constant 1 : index
    %158 = memref.load %arg2[%c3_102, %c1_103] : memref<4x6xf32, #tpu.memory_space<smem>>
    %159 = vector.broadcast %158 : f32 to vector<2x128xf32>
    %160 = arith.mulf %159, %3 : vector<2x128xf32>
    %161 = arith.addf %157, %160 : vector<2x128xf32>
    %c3_104 = arith.constant 3 : index
    %c2_105 = arith.constant 2 : index
    %162 = memref.load %arg2[%c3_104, %c2_105] : memref<4x6xf32, #tpu.memory_space<smem>>
    %163 = vector.broadcast %162 : f32 to vector<2x128xf32>
    %164 = arith.mulf %163, %5 : vector<2x128xf32>
    %165 = arith.addf %161, %164 : vector<2x128xf32>
    %c3_106 = arith.constant 3 : index
    %c3_107 = arith.constant 3 : index
    %166 = memref.load %arg2[%c3_106, %c3_107] : memref<4x6xf32, #tpu.memory_space<smem>>
    %167 = vector.broadcast %166 : f32 to vector<2x128xf32>
    %168 = arith.mulf %167, %7 : vector<2x128xf32>
    %169 = arith.addf %165, %168 : vector<2x128xf32>
    %c3_108 = arith.constant 3 : index
    %c4_109 = arith.constant 4 : index
    %170 = memref.load %arg2[%c3_108, %c4_109] : memref<4x6xf32, #tpu.memory_space<smem>>
    %171 = vector.broadcast %170 : f32 to vector<2x128xf32>
    %172 = arith.mulf %171, %9 : vector<2x128xf32>
    %173 = arith.addf %169, %172 : vector<2x128xf32>
    %c3_110 = arith.constant 3 : index
    %c5_111 = arith.constant 5 : index
    %174 = memref.load %arg2[%c3_110, %c5_111] : memref<4x6xf32, #tpu.memory_space<smem>>
    %175 = vector.broadcast %174 : f32 to vector<2x128xf32>
    %176 = arith.mulf %175, %11 : vector<2x128xf32>
    %177 = arith.addf %173, %176 : vector<2x128xf32>
    %c3_112 = arith.constant 3 : index
    %c0_113 = arith.constant 0 : index
    %178 = memref.load %arg3[%c3_112, %c0_113] : memref<4x4xf32, #tpu.memory_space<smem>>
    %179 = vector.broadcast %178 : f32 to vector<2x128xf32>
    %180 = arith.mulf %179, %13 : vector<2x128xf32>
    %181 = arith.addf %177, %180 : vector<2x128xf32>
    %c3_114 = arith.constant 3 : index
    %c1_115 = arith.constant 1 : index
    %182 = memref.load %arg3[%c3_114, %c1_115] : memref<4x4xf32, #tpu.memory_space<smem>>
    %183 = vector.broadcast %182 : f32 to vector<2x128xf32>
    %184 = arith.mulf %183, %15 : vector<2x128xf32>
    %185 = arith.addf %181, %184 : vector<2x128xf32>
    %c3_116 = arith.constant 3 : index
    %c2_117 = arith.constant 2 : index
    %186 = memref.load %arg3[%c3_116, %c2_117] : memref<4x4xf32, #tpu.memory_space<smem>>
    %187 = vector.broadcast %186 : f32 to vector<2x128xf32>
    %188 = arith.mulf %187, %17 : vector<2x128xf32>
    %189 = arith.addf %185, %188 : vector<2x128xf32>
    %c3_118 = arith.constant 3 : index
    %c3_119 = arith.constant 3 : index
    %190 = memref.load %arg3[%c3_118, %c3_119] : memref<4x4xf32, #tpu.memory_space<smem>>
    %191 = vector.broadcast %190 : f32 to vector<2x128xf32>
    %192 = arith.mulf %191, %19 : vector<2x128xf32>
    %193 = arith.addf %189, %192 : vector<2x128xf32>
    %cst_120 = arith.constant 0.000000e+00 : f32
    %194 = vector.broadcast %cst_120 : f32 to vector<2x128xf32>
    %195 = arith.maximumf %193, %194 : vector<2x128xf32>
    %c0_121 = arith.constant 0 : index
    %196 = memref.load %arg6[%c0_121] : memref<4xf32, #tpu.memory_space<smem>>
    %197 = vector.broadcast %196 : f32 to vector<2x128xf32>
    %c0_122 = arith.constant 0 : index
    %c0_123 = arith.constant 0 : index
    %198 = memref.load %arg5[%c0_122, %c0_123] : memref<4x4xf32, #tpu.memory_space<smem>>
    %199 = vector.broadcast %198 : f32 to vector<2x128xf32>
    %200 = arith.mulf %199, %63 : vector<2x128xf32>
    %201 = arith.addf %197, %200 : vector<2x128xf32>
    %c0_124 = arith.constant 0 : index
    %c1_125 = arith.constant 1 : index
    %202 = memref.load %arg5[%c0_124, %c1_125] : memref<4x4xf32, #tpu.memory_space<smem>>
    %203 = vector.broadcast %202 : f32 to vector<2x128xf32>
    %204 = arith.mulf %203, %107 : vector<2x128xf32>
    %205 = arith.addf %201, %204 : vector<2x128xf32>
    %c0_126 = arith.constant 0 : index
    %c2_127 = arith.constant 2 : index
    %206 = memref.load %arg5[%c0_126, %c2_127] : memref<4x4xf32, #tpu.memory_space<smem>>
    %207 = vector.broadcast %206 : f32 to vector<2x128xf32>
    %208 = arith.mulf %207, %151 : vector<2x128xf32>
    %209 = arith.addf %205, %208 : vector<2x128xf32>
    %c0_128 = arith.constant 0 : index
    %c3_129 = arith.constant 3 : index
    %210 = memref.load %arg5[%c0_128, %c3_129] : memref<4x4xf32, #tpu.memory_space<smem>>
    %211 = vector.broadcast %210 : f32 to vector<2x128xf32>
    %212 = arith.mulf %211, %195 : vector<2x128xf32>
    %213 = arith.addf %209, %212 : vector<2x128xf32>
    %214 = arith.negf %213 : vector<2x128xf32>
    %215 = math.exp %214 : vector<2x128xf32>
    %cst_130 = arith.constant 1.000000e+00 : f32
    %216 = vector.broadcast %cst_130 : f32 to vector<2x128xf32>
    %217 = arith.addf %216, %215 : vector<2x128xf32>
    %218 = arith.divf %216, %217 : vector<2x128xf32>
    %219 = arith.mulf %218, %13 : vector<2x128xf32>
    %c0_131 = arith.constant 0 : index
    %c0_132 = arith.constant 0 : index
    %c0_133 = arith.constant 0 : index
    %c0_134 = arith.constant 0 : index
    %220 = vector.load %arg9[%c0_131, %c0_132, %c0_133, %c0_134] : memref<1x4x2x128xf32, #tpu.memory_space<vmem>>, vector<1x1x2x128xf32>
    %221 = vector.shape_cast %220 : vector<1x1x2x128xf32> to vector<2x128xf32>
    %222 = vector.shape_cast %219 : vector<2x128xf32> to vector<1x1x2x128xf32>
    tpu.vector_store %arg9[%c0_131, %c0_132, %c0_133, %c0_134], %222 {strides = array<i32>} : memref<1x4x2x128xf32, #tpu.memory_space<vmem>>, vector<1x1x2x128xf32>,
    %c1_135 = arith.constant 1 : index
    %223 = memref.load %arg6[%c1_135] : memref<4xf32, #tpu.memory_space<smem>>
    %224 = vector.broadcast %223 : f32 to vector<2x128xf32>
    %c1_136 = arith.constant 1 : index
    %c0_137 = arith.constant 0 : index
    %225 = memref.load %arg5[%c1_136, %c0_137] : memref<4x4xf32, #tpu.memory_space<smem>>
    %226 = vector.broadcast %225 : f32 to vector<2x128xf32>
    %227 = arith.mulf %226, %63 : vector<2x128xf32>
    %228 = arith.addf %224, %227 : vector<2x128xf32>
    %c1_138 = arith.constant 1 : index
    %c1_139 = arith.constant 1 : index
    %229 = memref.load %arg5[%c1_138, %c1_139] : memref<4x4xf32, #tpu.memory_space<smem>>
    %230 = vector.broadcast %229 : f32 to vector<2x128xf32>
    %231 = arith.mulf %230, %107 : vector<2x128xf32>
    %232 = arith.addf %228, %231 : vector<2x128xf32>
    %c1_140 = arith.constant 1 : index
    %c2_141 = arith.constant 2 : index
    %233 = memref.load %arg5[%c1_140, %c2_141] : memref<4x4xf32, #tpu.memory_space<smem>>
    %234 = vector.broadcast %233 : f32 to vector<2x128xf32>
    %235 = arith.mulf %234, %151 : vector<2x128xf32>
    %236 = arith.addf %232, %235 : vector<2x128xf32>
    %c1_142 = arith.constant 1 : index
    %c3_143 = arith.constant 3 : index
    %237 = memref.load %arg5[%c1_142, %c3_143] : memref<4x4xf32, #tpu.memory_space<smem>>
    %238 = vector.broadcast %237 : f32 to vector<2x128xf32>
    %239 = arith.mulf %238, %195 : vector<2x128xf32>
    %240 = arith.addf %236, %239 : vector<2x128xf32>
    %241 = arith.negf %240 : vector<2x128xf32>
    %242 = math.exp %241 : vector<2x128xf32>
    %cst_144 = arith.constant 1.000000e+00 : f32
    %243 = vector.broadcast %cst_144 : f32 to vector<2x128xf32>
    %244 = arith.addf %243, %242 : vector<2x128xf32>
    %245 = arith.divf %243, %244 : vector<2x128xf32>
    %246 = arith.mulf %245, %15 : vector<2x128xf32>
    %c0_145 = arith.constant 0 : index
    %c1_146 = arith.constant 1 : index
    %c0_147 = arith.constant 0 : index
    %c0_148 = arith.constant 0 : index
    %247 = vector.load %arg9[%c0_145, %c1_146, %c0_147, %c0_148] : memref<1x4x2x128xf32, #tpu.memory_space<vmem>>, vector<1x1x2x128xf32>
    %248 = vector.shape_cast %247 : vector<1x1x2x128xf32> to vector<2x128xf32>
    %249 = vector.shape_cast %246 : vector<2x128xf32> to vector<1x1x2x128xf32>
    tpu.vector_store %arg9[%c0_145, %c1_146, %c0_147, %c0_148], %249 {strides = array<i32>} : memref<1x4x2x128xf32, #tpu.memory_space<vmem>>, vector<1x1x2x128xf32>,
    %c2_149 = arith.constant 2 : index
    %250 = memref.load %arg6[%c2_149] : memref<4xf32, #tpu.memory_space<smem>>
    %251 = vector.broadcast %250 : f32 to vector<2x128xf32>
    %c2_150 = arith.constant 2 : index
    %c0_151 = arith.constant 0 : index
    %252 = memref.load %arg5[%c2_150, %c0_151] : memref<4x4xf32, #tpu.memory_space<smem>>
    %253 = vector.broadcast %252 : f32 to vector<2x128xf32>
    %254 = arith.mulf %253, %63 : vector<2x128xf32>
    %255 = arith.addf %251, %254 : vector<2x128xf32>
    %c2_152 = arith.constant 2 : index
    %c1_153 = arith.constant 1 : index
    %256 = memref.load %arg5[%c2_152, %c1_153] : memref<4x4xf32, #tpu.memory_space<smem>>
    %257 = vector.broadcast %256 : f32 to vector<2x128xf32>
    %258 = arith.mulf %257, %107 : vector<2x128xf32>
    %259 = arith.addf %255, %258 : vector<2x128xf32>
    %c2_154 = arith.constant 2 : index
    %c2_155 = arith.constant 2 : index
    %260 = memref.load %arg5[%c2_154, %c2_155] : memref<4x4xf32, #tpu.memory_space<smem>>
    %261 = vector.broadcast %260 : f32 to vector<2x128xf32>
    %262 = arith.mulf %261, %151 : vector<2x128xf32>
    %263 = arith.addf %259, %262 : vector<2x128xf32>
    %c2_156 = arith.constant 2 : index
    %c3_157 = arith.constant 3 : index
    %264 = memref.load %arg5[%c2_156, %c3_157] : memref<4x4xf32, #tpu.memory_space<smem>>
    %265 = vector.broadcast %264 : f32 to vector<2x128xf32>
    %266 = arith.mulf %265, %195 : vector<2x128xf32>
    %267 = arith.addf %263, %266 : vector<2x128xf32>
    %268 = arith.negf %267 : vector<2x128xf32>
    %269 = math.exp %268 : vector<2x128xf32>
    %cst_158 = arith.constant 1.000000e+00 : f32
    %270 = vector.broadcast %cst_158 : f32 to vector<2x128xf32>
    %271 = arith.addf %270, %269 : vector<2x128xf32>
    %272 = arith.divf %270, %271 : vector<2x128xf32>
    %273 = arith.mulf %272, %17 : vector<2x128xf32>
    %c0_159 = arith.constant 0 : index
    %c2_160 = arith.constant 2 : index
    %c0_161 = arith.constant 0 : index
    %c0_162 = arith.constant 0 : index
    %274 = vector.load %arg9[%c0_159, %c2_160, %c0_161, %c0_162] : memref<1x4x2x128xf32, #tpu.memory_space<vmem>>, vector<1x1x2x128xf32>
    %275 = vector.shape_cast %274 : vector<1x1x2x128xf32> to vector<2x128xf32>
    %276 = vector.shape_cast %273 : vector<2x128xf32> to vector<1x1x2x128xf32>
    tpu.vector_store %arg9[%c0_159, %c2_160, %c0_161, %c0_162], %276 {strides = array<i32>} : memref<1x4x2x128xf32, #tpu.memory_space<vmem>>, vector<1x1x2x128xf32>,
    %c3_163 = arith.constant 3 : index
    %277 = memref.load %arg6[%c3_163] : memref<4xf32, #tpu.memory_space<smem>>
    %278 = vector.broadcast %277 : f32 to vector<2x128xf32>
    %c3_164 = arith.constant 3 : index
    %c0_165 = arith.constant 0 : index
    %279 = memref.load %arg5[%c3_164, %c0_165] : memref<4x4xf32, #tpu.memory_space<smem>>
    %280 = vector.broadcast %279 : f32 to vector<2x128xf32>
    %281 = arith.mulf %280, %63 : vector<2x128xf32>
    %282 = arith.addf %278, %281 : vector<2x128xf32>
    %c3_166 = arith.constant 3 : index
    %c1_167 = arith.constant 1 : index
    %283 = memref.load %arg5[%c3_166, %c1_167] : memref<4x4xf32, #tpu.memory_space<smem>>
    %284 = vector.broadcast %283 : f32 to vector<2x128xf32>
    %285 = arith.mulf %284, %107 : vector<2x128xf32>
    %286 = arith.addf %282, %285 : vector<2x128xf32>
    %c3_168 = arith.constant 3 : index
    %c2_169 = arith.constant 2 : index
    %287 = memref.load %arg5[%c3_168, %c2_169] : memref<4x4xf32, #tpu.memory_space<smem>>
    %288 = vector.broadcast %287 : f32 to vector<2x128xf32>
    %289 = arith.mulf %288, %151 : vector<2x128xf32>
    %290 = arith.addf %286, %289 : vector<2x128xf32>
    %c3_170 = arith.constant 3 : index
    %c3_171 = arith.constant 3 : index
    %291 = memref.load %arg5[%c3_170, %c3_171] : memref<4x4xf32, #tpu.memory_space<smem>>
    %292 = vector.broadcast %291 : f32 to vector<2x128xf32>
    %293 = arith.mulf %292, %195 : vector<2x128xf32>
    %294 = arith.addf %290, %293 : vector<2x128xf32>
    %295 = arith.negf %294 : vector<2x128xf32>
    %296 = math.exp %295 : vector<2x128xf32>
    %cst_172 = arith.constant 1.000000e+00 : f32
    %297 = vector.broadcast %cst_172 : f32 to vector<2x128xf32>
    %298 = arith.addf %297, %296 : vector<2x128xf32>
    %299 = arith.divf %297, %298 : vector<2x128xf32>
    %300 = arith.mulf %299, %19 : vector<2x128xf32>
    %c0_173 = arith.constant 0 : index
    %c3_174 = arith.constant 3 : index
    %c0_175 = arith.constant 0 : index
    %c0_176 = arith.constant 0 : index
    %301 = vector.load %arg9[%c0_173, %c3_174, %c0_175, %c0_176] : memref<1x4x2x128xf32, #tpu.memory_space<vmem>>, vector<1x1x2x128xf32>
    %302 = vector.shape_cast %301 : vector<1x1x2x128xf32> to vector<2x128xf32>
    %303 = vector.shape_cast %300 : vector<2x128xf32> to vector<1x1x2x128xf32>
    tpu.vector_store %arg9[%c0_173, %c3_174, %c0_175, %c0_176], %303 {strides = array<i32>} : memref<1x4x2x128xf32, #tpu.memory_space<vmem>>, vector<1x1x2x128xf32>,
    return
  }
  func.func @transform_0(%arg0: i32, %arg1: i32) -> (i32, i32) {
    %c0_i32 = arith.constant 0 : i32
    %c0_i32_0 = arith.constant 0 : i32
    %c0_i32_1 = arith.constant 0 : i32
    return %c0_i32, %c0_i32_0 : i32, i32
  }
  func.func @transform_1(%arg0: i32, %arg1: i32) -> (i32, i32) {
    %c0_i32 = arith.constant 0 : i32
    %c0_i32_0 = arith.constant 0 : i32
    %c0_i32_1 = arith.constant 0 : i32
    return %c0_i32, %c0_i32_0 : i32, i32
  }
  func.func @transform_2(%arg0: i32, %arg1: i32) -> i32 {
    %c0_i32 = arith.constant 0 : i32
    %c0_i32_0 = arith.constant 0 : i32
    return %c0_i32 : i32
  }
  func.func @transform_3(%arg0: i32, %arg1: i32) -> (i32, i32) {
    %c0_i32 = arith.constant 0 : i32
    %c0_i32_0 = arith.constant 0 : i32
    %c0_i32_1 = arith.constant 0 : i32
    return %c0_i32, %c0_i32_0 : i32, i32
  }
  func.func @transform_4(%arg0: i32, %arg1: i32) -> i32 {
    %c0_i32 = arith.constant 0 : i32
    %c0_i32_0 = arith.constant 0 : i32
    return %c0_i32 : i32
  }
  func.func @transform_5(%arg0: i32, %arg1: i32) -> (i32, i32, i32, i32) {
    %c0_i32 = arith.constant 0 : i32
    %c0_i32_0 = arith.constant 0 : i32
    %c0_i32_1 = arith.constant 0 : i32
    return %arg0, %c0_i32, %arg1, %c0_i32_0 : i32, i32, i32, i32
  }
  func.func @transform_6(%arg0: i32, %arg1: i32) -> (i32, i32, i32, i32) {
    %c0_i32 = arith.constant 0 : i32
    %c0_i32_0 = arith.constant 0 : i32
    %c0_i32_1 = arith.constant 0 : i32
    return %arg0, %c0_i32, %arg1, %c0_i32_0 : i32, i32, i32, i32
  }
  func.func @transform_7(%arg0: i32, %arg1: i32) -> (i32, i32, i32, i32) {
    %c0_i32 = arith.constant 0 : i32
    %c0_i32_0 = arith.constant 0 : i32
    %c0_i32_1 = arith.constant 0 : i32
    return %arg0, %c0_i32, %arg1, %c0_i32_0 : i32, i32, i32, i32
  }
}

</mosaic_0001>

<bundles_post_ra>
// kernel: attention_gate_forward.1
= control target key start
LH: loop header
LB: loop body
LE: loop exit
PB: predicated region body
PF: predicated region fallthrough
CT: control target
= control target key end

     0   :  { %12 = vsyncpa [#allocation3], 0  ;;  %s1573_s0 = inlined_call_operand.vmem [shape: f32[4,6], index: 0, kind: input, shape index: {}]   ;;  %s1574_s1 = inlined_call_operand.vmem [shape: f32[4,4], index: 1, kind: input, shape index: {}]   ;;  %s1575_s2 = inlined_call_operand.vmem [shape: f32[4], index: 2, kind: input, shape index: {}]   ;;  %s1576_s3 = inlined_call_operand.vmem [shape: f32[4,4], index: 3, kind: input, shape index: {}]   ;;  %s1577_s4 = inlined_call_operand.vmem [shape: f32[4], index: 4, kind: input, shape index: {}]   ;;  %s1578_s5 = inlined_call_operand.vmem [shape: f32[2,6,2,128], index: 5, kind: input, shape index: {}]   ;;  %s1579_s6 = inlined_call_operand.vmem [shape: f32[2,4,2,128], index: 6, kind: input, shape index: {}]   ;;  %s1580_s7 = inlined_call_operand.vmem [shape: f32[2,4,2,128], index: 7, kind: output, shape index: {}]  }
   0x1   :  { %13 = vsyncpa [#allocation5], 0 }
   0x2   :  { %14 = vsyncpa [#allocation8], 0  ;;  %s1200_s24 = smov 0   ;;  %s1202_s25 = smov 0  }
   0x3   :  { %s1204_s26 = smov 0  }
   0x4 LB: > { %s250_s29 = sshll.u32 %s1574_s1, 4  ;;  %s854_s30 = sadd.s32 4294967295, %s1153_s26   ;;  %s1153_s26 = sphi %s1204_s26, %s20_s26   ;;  %s1149_s25 = sphi %s1202_s25, %s1595_s25   ;;  %s1145_s24 = sphi %s1200_s24, %s1594_s24   ;;  %s251_s29 = int_to_ptr.vmem [resolvable:$true] %s250_s29 }
   0x5   : > { %p856_p0 = scmp.ge.s32.totalorder %s1153_s26, 1  ;;  %p226_p1 = scmp.lt.s32.totalorder %s1153_s26, 3 }
   0x6   : > { %p1221_p2 = scmp.eq.s32.totalorder %s854_s30, 0  ;;  %s272_s12 = sshll.u32 %s1576_s3, 4  ;;  %s273_s12 = int_to_ptr.vmem [resolvable:$true] %s272_s12 }
   0x7   : > { %p1225_p3 = pnand %p856_p0, %p226_p1  ;;  %s32_s14 = sadd.s32 1, %s1149_s25 }
   0x8   : > { %s1585_s8 = scalar_select %p1221_p2, 1, 0 }
   0x9   : > { %s1586_s9 = scalar_select %p1225_p3, 1, 0 }
   0xa   : > { %p973_p4 = pneg %p1225_p3  ;;  %s239_s17 = sshll.u32 %s1573_s0, 4  ;;  %s240_s17 = int_to_ptr.vmem [resolvable:$true] %s239_s17 }
   0xb   : > { %p1244_p6 = scmp.ge.s32.totalorder %s32_s14, 2  ;;  %s1044_s19 = scalar_lea.vmem %s251_s29, 64 }
   0xc   : > { %p1236_p5 = pnand %p1221_p2, %p973_p4  ;;  %p1045_p7 = scmp.ne.s32.totalorder %s251_s29, %s1044_s19 }
   0xd   : > { %s1588_s18 = scalar_select %p1244_p6, 1, 0 }
   0xe   : > { %p1250_p8 = pneg %p1236_p5  ;;  %p1052_p11 = scmp.lt.s32.totalorder %s251_s29, %s251_s29 }
   0xf   : > { %p1053_p12 = scmp.lt.s32.totalorder %s1044_s19, %s1044_s19 }
  0x10   : > { %p1047_p9 = pnand %p1250_p8, %p1045_p7 }
  0x11   : > { %p1054_p13 = por %p1053_p12, %p1052_p11 }
  0x12   : > { %p1048_p10 = pneg %p1047_p9 }
  0x14   : > { %p1055_p0 = pnand %p1054_p13, %p1048_p10 }
  0x16   : > { %1058 = shalt.err (!%p1055_p0)
}
  0x17   : > { %s1155_s21 = smov [#allocation4]   ;;  %s1059_s22 = scalar_lea.vmem %s273_s12, 64 }
  0x18   : > { %979 = dma.vmem_to_smem (!%p1236_p5), %s251_s29, 64, %s1155_s21, [#allocation5]  }
  0x19   : > { %p1060_p1 = scmp.ne.s32.totalorder %s273_s12, %s1059_s22  ;;  %p1067_p3 = scmp.lt.s32.totalorder %s273_s12, %s273_s12 }
  0x1a   : > { %p1068_p6 = scmp.lt.s32.totalorder %s1059_s22, %s1059_s22 }
  0x1b   : > { %p1062_p4 = pnand %p1060_p1, %p1250_p8 }
  0x1c   : > { %p1069_p7 = por %p1068_p6, %p1067_p3 }
  0x1d   : > { %p1063_p2 = pneg %p1062_p4 }
  0x1f   : > { %p1070_p9 = pnand %p1069_p7, %p1063_p2 }
  0x21   : > { %1073 = shalt.err (!%p1070_p9)
}
  0x22   : > { %s1156_s23 = smov [#allocation7]   ;;  %p1590_p10 = scmp.ne.s32.totalorder %s1588_s18, 0 }
  0x23   : > { %985 = dma.vmem_to_smem (!%p1236_p5), %s273_s12, 64, %s1156_s23, [#allocation8]  }
  0x24   : > { %s1597_s14 = smov (%p1590_p10, %s32_s14), 0  ;;  %s1074_s27 = scalar_lea.vmem %s240_s17, 64 }
  0x25   : > { %p1075_p11 = scmp.ne.s32.totalorder %s240_s17, %s1074_s27  ;;  %p1082_p0 = scmp.lt.s32.totalorder %s240_s17, %s240_s17 }
  0x26   : > { %p1083_p1 = scmp.lt.s32.totalorder %s1074_s27, %s1074_s27 }
  0x27   : > { %p1077_p12 = pnand %p1075_p11, %p1250_p8 }
  0x28   : > { %p1084_p3 = por %p1083_p1, %p1082_p0 }
  0x29   : > { %p1078_p13 = pneg %p1077_p12 }
  0x2b   : > { %p1085_p2 = pnand %p1084_p3, %p1078_p13 }
  0x2d   : > { %1088 = shalt.err (!%p1085_p2)
}
  0x2e   : > { %s1157_s28 = smov [#allocation2]   ;;  %s261_s10 = sshll.u32 %s1575_s2, 4  ;;  %s262_s10 = int_to_ptr.vmem [resolvable:$true] %s261_s10 }
  0x2f   : > { %976 = dma.vmem_to_smem (!%p1236_p5), %s240_s17, 64, %s1157_s28, [#allocation3]  }
  0x30   : > { %s283_s15 = sshll.u32 %s1577_s4, 4  ;;  %s1089_s16 = scalar_lea.vmem %s262_s10, 16  ;;  %s284_s15 = int_to_ptr.vmem [resolvable:$true] %s283_s15 }
  0x31   : > { %p1090_p6 = scmp.ne.s32.totalorder %s262_s10, %s1089_s16  ;;  %p1097_p9 = scmp.lt.s32.totalorder %s262_s10, %s262_s10 }
  0x32   : > { %p1098_p10 = scmp.lt.s32.totalorder %s1089_s16, %s1089_s16 }
  0x33   : > { %p1092_p4 = pnand %p1090_p6, %p1250_p8 }
  0x34   : > { %p1099_p11 = por %p1098_p10, %p1097_p9 }
  0x35   : > { %p1093_p7 = pneg %p1092_p4 }
  0x37   : > { %p1100_p12 = pnand %p1099_p11, %p1093_p7 }
  0x39   : > { %1103 = shalt.err (!%p1100_p12)
}
  0x3a   : > { %s1158_s17 = smov [#allocation6]   ;;  %s1104_s18 = scalar_lea.vmem %s284_s15, 16 }
  0x3b   : > { %982 = dma.vmem_to_smem (!%p1236_p5), %s262_s10, 16, %s1158_s17, [#allocation5]  }
  0x3c   : > { %p1105_p13 = scmp.ne.s32.totalorder %s284_s15, %s1104_s18  ;;  %p1112_p3 = scmp.lt.s32.totalorder %s284_s15, %s284_s15 }
  0x3d   : > { %p1113_p2 = scmp.lt.s32.totalorder %s1104_s18, %s1104_s18 }
  0x3e   : > { %p1107_p0 = pnand %p1105_p13, %p1250_p8 }
  0x3f   : > { %p1114_p6 = por %p1113_p2, %p1112_p3 }
  0x40   : > { %p1108_p1 = pneg %p1107_p0 }
  0x42   : > { %p1115_p4 = pnand %p1114_p6, %p1108_p1 }
  0x44   : > { %1118 = shalt.err (!%p1115_p4)
}
  0x45   : > { %s1159_s19 = smov [#allocation9]   ;;  %p1591_p7 = scmp.ne.s32.totalorder %s1586_s9, 0 }
  0x46   : > { %988 = dma.vmem_to_smem (!%p1236_p5), %s284_s15, 16, %s1159_s19, [#allocation8]  }
  0x47   : > { %318 = sbr.rel (%p1591_p7) target bundleno = 176 (0xb0), region = 48  ;;  %p1592_p9 = scmp.ne.s32.totalorder (!%p1591_p7), %s1585_s8, 0 }
  0x4e   : > { %1132 = dma.done.wait (%p1592_p9), [#allocation3], 64  }
  0x4f   : > { %1134 = vsyncadd (%p1592_p9), [#allocation3], 4294967232 }
  0x50   : > { %1136 = dma.done.wait (%p1592_p9), [#allocation5], 80  }
  0x51   : > { %1138 = vsyncadd (%p1592_p9), [#allocation5], 4294967216 }
  0x52   : > { %1140 = dma.done.wait (%p1592_p9), [#allocation8], 80  }
  0x53   : > { %1142 = vsyncadd (%p1592_p9), [#allocation8], 4294967216 }
  0x54   : > { %340 = sfence }
  0x55   : > { %p381_p5 = scmp.lt.s32.totalorder %s1145_s24, 1  ;;  %s423_s9 = sld [smem:[#allocation6]] }
  0x56   : > { %s425_s13 = sld [smem:[#allocation2]]  ;;  %s882_s20 = sld [smem:[#allocation2 + $0x1]] }
  0x57   : > { %s1599_s24 = smov (!%p381_p5, %s1145_s24), 1  ;;  %s883_s21 = sld [smem:[#allocation2 + $0x2]] }
  0x58   : > { %s884_s22 = sld [smem:[#allocation2 + $0x3]]  ;;  %s952_s23 = smul.u32 12, %s1599_s24 }
  0x59   : > { %s1584_s27 = sshll.u32 %s1599_s24, 3  ;;  %s885_s12 = sld [smem:[#allocation2 + $0x4]] }
  0x5a   : > { %s388_s8 = scalar_lea.vmem %s1578_s5, %s952_s23  ;;  %s1318_s11 = scalar_lea.vmem %s1579_s6, %s1584_s27 }
  0x5b   : > { %v424_v0 = vstv %s423_s9  ;;  %v1307_v1 = vld [vmem:[%s388_s8] sm:$0x3]  ;;  %v1309_v2 = vld [vmem:[%s388_s8 + $0x2] sm:$0x3]  ;;  %v1311_v3 = vld [vmem:[%s388_s8 + $0x4] sm:$0x3] }
  0x5c   : > { %v426_v4 = vstv %s425_s13  ;;  %v430_v6 = vstv %s882_s20  ;;  %v1321_v7 = vld [vmem:[%s388_s8 + $0x6] sm:$0x3]  ;;  %s886_s15 = sld [smem:[#allocation2 + $0x5]]  ;;  %s1325_s16 = sld [smem:[#allocation4]]  ;;  %v1333_v13 = vld [vmem:[%s388_s8 + $0x8] sm:$0x3] }
  0x5d   : > { %v427_v5 = vmul.f32 %v426_v4, %v1307_v1  ;;  %v431_v8 = vmul.f32 %v1309_v2, %v430_v6  ;;  %v434_v9 = vstv %s883_s21  ;;  %s1327_s17 = sld [smem:[#allocation4 + $0x1]]  ;;  %s1329_s18 = sld [smem:[#allocation4 + $0x2]]  ;;  %v1340_v16 = vld [vmem:[%s388_s8 + $0xa] sm:$0x3]  ;;  %v1351_v18 = vld [vmem:[%s1318_s11] sm:$0x3] }
  0x5e   : > { %v438_v10 = vstv %s884_s22  ;;  %v435_v12 = vmul.f32 %v1311_v3, %v434_v9  ;;  %s1331_s19 = sld [smem:[#allocation4 + $0x3]]  ;;  %s1336_s9 = sld [smem:[#allocation6 + $0x1]]  ;;  %v1365_v25 = vld [vmem:[%s1318_s11 + $0x2] sm:$0x3]  ;;  %v1388_v35 = vld [vmem:[%s1318_s11 + $0x4] sm:$0x3] }
  0x5f   : > { %v428_v11 = vadd.f32 %v427_v5, %v424_v0  ;;  %v439_v15 = vmul.f32 %v1321_v7, %v438_v10  ;;  %s1338_s13 = sld [smem:[#allocation2 + $0x80]]  ;;  %s1342_s20 = sld [smem:[#allocation2 + $0x81]]  ;;  %v442_v19 = vstv %s885_s12  ;;  %v1391_v36 = vld [vmem:[%s1318_s11 + $0x6] sm:$0x3] }
  0x60   : > { %s1344_s21 = sld [smem:[#allocation2 + $0x82]]  ;;  %s1346_s22 = sld [smem:[#allocation2 + $0x83]]  ;;  %v443_v22 = vmul.f32 %v1333_v13, %v442_v19 }
  0x61   : > { %v432_v14 = vadd.f32 %v431_v8, %v428_v11  ;;  %s1348_s23 = sld [smem:[#allocation2 + $0x84]]  ;;  %s1353_s28 = sld [smem:[#allocation2 + $0x85]] }
  0x62   : > { %v446_v20 = vstv %s886_s15  ;;  %s1355_s29 = sld [smem:[#allocation4 + $0x80]]  ;;  %v450_v24 = vstv %s1325_s16  ;;  %s1360_s8 = sld [smem:[#allocation4 + $0x81]] }
  0x63   : > { %v436_v17 = vadd.f32 %v435_v12, %v432_v14  ;;  %v447_v23 = vmul.f32 %v1340_v16, %v446_v20  ;;  %s1362_s30 = sld [smem:[#allocation4 + $0x82]]  ;;  %v454_v26 = vstv %s1327_s17  ;;  %s1368_s10 = sld [smem:[#allocation4 + $0x83]]  ;;  %v451_v28 = vmul.f32 %v450_v24, %v1351_v18 }
  0x64   : > { %s1370_s12 = sld [smem:[#allocation6 + $0x2]]  ;;  %v458_v29 = vstv %s1329_s18  ;;  %v462_v30 = vstv %s1331_s19  ;;  %s1375_s15 = sld [smem:[#allocation2 + $0x100]]  ;;  %v467_v31 = vstv %s1336_s9  ;;  %v455_v38 = vmul.f32 %v1365_v25, %v454_v26 }
  0x65   : > { %v440_v21 = vadd.f32 %v439_v15, %v436_v17  ;;  %s1377_s16 = sld [smem:[#allocation2 + $0x101]]  ;;  %v469_v32 = vstv %s1338_s13  ;;  %v473_v33 = vstv %s1342_s20  ;;  %s1383_s17 = sld [smem:[#allocation2 + $0x102]]  ;;  %v459_v48 = vmul.f32 %v1388_v35, %v458_v29 }
  0x66   : > { %v477_v34 = vstv %s1344_s21  ;;  %s1385_s27 = sld [smem:[#allocation2 + $0x103]]  ;;  %v470_v39 = vmul.f32 %v469_v32, %v1307_v1  ;;  %v474_v40 = vmul.f32 %v1309_v2, %v473_v33  ;;  %s1396_s18 = sld [smem:[#allocation2 + $0x104]]  ;;  %v481_v41 = vstv %s1346_s22 }
  0x67   : > { %v444_v27 = vadd.f32 %v443_v22, %v440_v21  ;;  %v485_v42 = vstv %s1348_s23  ;;  %v489_v43 = vstv %s1353_s28  ;;  %s1402_s19 = sld [smem:[#allocation2 + $0x105]]  ;;  %s1404_s9 = sld [smem:[#allocation4 + $0x100]]  ;;  %v478_v47 = vmul.f32 %v1311_v3, %v477_v34 }
  0x68   : > { %v493_v44 = vstv %s1355_s29  ;;  %v471_v46 = vadd.f32 %v470_v39, %v467_v31  ;;  %v463_v49 = vmul.f32 %v1391_v36, %v462_v30  ;;  %v482_v50 = vmul.f32 %v1321_v7, %v481_v41  ;;  %s1411_s11 = sld [smem:[#allocation4 + $0x101]]  ;;  %s1413_s13 = sld [smem:[#allocation4 + $0x102]] }
  0x69   : > { %v448_v37 = vadd.f32 %v447_v23, %v444_v27  ;;  %v486_v51 = vmul.f32 %v1333_v13, %v485_v42  ;;  %v490_v54 = vmul.f32 %v1340_v16, %v489_v43  ;;  %v494_v55 = vmul.f32 %v493_v44, %v1351_v18  ;;  %s1417_s20 = sld [smem:[#allocation4 + $0x103]]  ;;  %s1425_s22 = sld [smem:[#allocation2 + $0x180]] }
  0x6a   : > { %v475_v53 = vadd.f32 %v474_v40, %v471_v46  ;;  %s1419_s21 = sld [smem:[#allocation6 + $0x3]]  ;;  %v497_v56 = vstv %s1360_s8  ;;  %v510_v57 = vstv %s1370_s12  ;;  %v512_v58 = vstv %s1375_s15  ;;  %s1427_s23 = sld [smem:[#allocation2 + $0x181]] }
  0x6b   : > { %v452_v45 = vadd.f32 %v451_v28, %v448_v37  ;;  %v516_v59 = vstv %s1377_s16  ;;  %v501_v61 = vstv %s1362_s30  ;;  %v505_v62 = vstv %s1368_s10  ;;  %s1432_s28 = sld [smem:[#allocation2 + $0x182]]  ;;  %s1434_s29 = sld [smem:[#allocation2 + $0x183]] }
  0x6c   : > { %v479_v60 = vadd.f32 %v478_v47, %v475_v53  ;;  %v513_v63 = vmul.f32 %v512_v58, %v1307_v1  ;;  %v517_v4 = vmul.f32 %v1309_v2, %v516_v59  ;;  %v520_v5 = vstv %s1383_s17  ;;  %s1439_s8 = sld [smem:[#allocation2 + $0x184]]  ;;  %s1441_s12 = sld [smem:[#allocation2 + $0x185]] }
  0x6d   : > { %v456_v52 = vadd.f32 %v455_v38, %v452_v45  ;;  %v524_v6 = vstv %s1385_s27  ;;  %v521_v10 = vmul.f32 %v1311_v3, %v520_v5  ;;  %v528_v11 = vstv %s1396_s18  ;;  %s1451_s27 = sld [smem:[#allocation4 + $0x180]]  ;;  %s1456_s30 = sld [smem:[#allocation4 + $0x181]] }
  0x6e   : > { %v483_v8 = vadd.f32 %v482_v50, %v479_v60  ;;  %v514_v9 = vadd.f32 %v513_v63, %v510_v57  ;;  %v498_v12 = vmul.f32 %v1365_v25, %v497_v56  ;;  %v502_v14 = vmul.f32 %v1388_v35, %v501_v61  ;;  %s1460_s10 = sld [smem:[#allocation4 + $0x182]]  ;;  %s1462_s15 = sld [smem:[#allocation9]] }
  0x6f   : > { %v460_v0 = vadd.f32 %v459_v48, %v456_v52  ;;  %v532_v15 = vstv %s1402_s19  ;;  %v536_v17 = vstv %s1404_s9  ;;  %v506_v20 = vmul.f32 %v1391_v36, %v505_v62  ;;  %s1468_s16 = sld [smem:[#allocation7]]  ;;  %s1470_s17 = sld [smem:[#allocation7 + $0x1]] }
  0x70   : > { %v487_v19 = vadd.f32 %v486_v51, %v483_v8  ;;  %v518_v21 = vadd.f32 %v517_v4, %v514_v9  ;;  %v525_v22 = vmul.f32 %v1321_v7, %v524_v6  ;;  %v529_v24 = vmul.f32 %v1333_v13, %v528_v11  ;;  %s1478_s18 = sld [smem:[#allocation4 + $0x183]]  ;;  %s1480_s19 = sld [smem:[#allocation7 + $0x80]] }
  0x71   : > { %v464_v23 = vadd.f32 %v463_v49, %v460_v0  ;;  %v533_v26 = vmul.f32 %v1340_v16, %v532_v15  ;;  %v537_v27 = vmul.f32 %v536_v17, %v1351_v18  ;;  %v540_v30 = vstv %s1411_s11  ;;  %s1483_s9 = sld [smem:[#allocation7 + $0x2]]  ;;  %s1485_s11 = sld [smem:[#allocation9 + $0x1]] }
  0x72   : > { %v491_v28 = vadd.f32 %v490_v54, %v487_v19  ;;  %v522_v29 = vadd.f32 %v521_v10, %v518_v21  ;;  %v544_v31 = vstv %s1413_s13  ;;  %v548_v32 = vstv %s1417_s20  ;;  %s1492_s13 = sld [smem:[#allocation7 + $0x81]]  ;;  %s1495_s20 = sld [smem:[#allocation7 + $0x82]] }
  0x73   : > { %v553_v33 = vstv %s1419_s21  ;;  %v555_v34 = vstv %s1425_s22  ;;  %v559_v37 = vstv %s1427_s23  ;;  %v563_v42 = vstv %s1432_s28  ;;  %s1497_s21 = sld [smem:[#allocation9 + $0x2]]  ;;  %s1503_s22 = sld [smem:[#allocation7 + $0x100]] }
  0x74   : > { %v495_v38 = vadd.f32 %v494_v55, %v491_v28  ;;  %v526_v39 = vadd.f32 %v525_v22, %v522_v29  ;;  %v556_v40 = vmul.f32 %v555_v34, %v1307_v1  ;;  %v560_v41 = vmul.f32 %v1309_v2, %v559_v37  ;;  %s1505_s23 = sld [smem:[#allocation7 + $0x101]]  ;;  %s1512_s28 = sld [smem:[#allocation7 + $0x102]] }
  0x75   : > { %v567_v43 = vstv %s1434_s29  ;;  %v571_v44 = vstv %s1439_s8  ;;  %v575_v45 = vstv %s1441_s12  ;;  %v564_v49 = vmul.f32 %v1311_v3, %v563_v42  ;;  %s1515_s29 = sld [smem:[#allocation9 + $0x3]]  ;;  %s1521_s8 = sld [smem:[#allocation7 + $0x180]] }
  0x76   : > { %v499_v46 = vadd.f32 %v498_v12, %v495_v38  ;;  %v530_v47 = vadd.f32 %v529_v24, %v526_v39  ;;  %v557_v48 = vadd.f32 %v556_v40, %v553_v33  ;;  %v1487_v1 = vmax.f32 %v464_v23, 0.0  ;;  %s1523_s12 = sld [smem:[#allocation7 + $0x181]] }
  0x77   : > { %v541_v2 = vmul.f32 %v1365_v25, %v540_v30  ;;  %v545_v50 = vmul.f32 %v1388_v35, %v544_v31  ;;  %v568_v51 = vmul.f32 %v1321_v7, %v567_v43  ;;  %v579_v54 = vstv %s1451_s27  ;;  %s1527_s27 = sld [smem:[#allocation7 + $0x182]] }
  0x78   : > { %v503_v52 = vadd.f32 %v502_v14, %v499_v46  ;;  %v534_v53 = vadd.f32 %v533_v26, %v530_v47  ;;  %v561_v3 = vadd.f32 %v560_v41, %v557_v48  ;;  %v549_v55 = vmul.f32 %v1391_v36, %v548_v32 }
  0x79   : > { %v572_v56 = vmul.f32 %v1333_v13, %v571_v44  ;;  %v576_v7 = vmul.f32 %v1340_v16, %v575_v45  ;;  %v583_v57 = vstv %s1456_s30  ;;  %v587_v61 = vstv %s1460_s10  ;;  %s1531_s30 = sld [smem:[#allocation7 + $0x3]] }
  0x7a   : > { %v507_v58 = vadd.f32 %v506_v20, %v503_v52  ;;  %v538_v59 = vadd.f32 %v537_v27, %v534_v53  ;;  %v565_v60 = vadd.f32 %v564_v49, %v561_v3  ;;  %v580_v62 = vmul.f32 %v579_v54, %v1351_v18  ;;  %s1534_s10 = sld [smem:[#allocation7 + $0x83]] }
  0x7b   : > { %v596_v63 = vstv %s1462_s15  ;;  %v598_v0 = vstv %s1468_s16  ;;  %v602_v4 = vstv %s1470_s17  ;;  %v584_v8 = vmul.f32 %v1365_v25, %v583_v57  ;;  %s1539_s15 = sld [smem:[#allocation7 + $0x103]]  ;;  %s1593_s17 = sshll.u32 %s1599_s24, 3 }
  0x7c   : > { %v508_v13 = vmax.f32 %v507_v58, 0.0  ;;  %v542_v16 = vadd.f32 %v541_v2, %v538_v59  ;;  %v569_v5 = vadd.f32 %v568_v51, %v565_v60  ;;  %v599_v6 = vmul.f32 %v598_v0, %v1487_v1  ;;  %s1541_s16 = sld [smem:[#allocation7 + $0x183]] }
  0x7d   : > { %v588_v9 = vmul.f32 %v1388_v35, %v587_v61  ;;  %v591_v10 = vstv %s1478_s18  ;;  %v624_v11 = vstv %s1480_s19  ;;  %v606_v15 = vstv %s1483_s9  ;;  %s404_s9 = scalar_lea.vmem %s1580_s7, %s1593_s17 }
  0x7e   : > { %v546_v12 = vadd.f32 %v545_v50, %v542_v16  ;;  %v573_v14 = vadd.f32 %v572_v56, %v569_v5  ;;  %v622_v17 = vstv %s1485_s11  ;;  %v600_v19 = vadd.f32 %v599_v6, %v596_v63 }
  0x7f   : > { %v603_v20 = vmul.f32 %v602_v4, %v508_v13  ;;  %v625_v21 = vmul.f32 %v624_v11, %v1487_v1  ;;  %v628_v22 = vstv %s1492_s13  ;;  %v632_v27 = vstv %s1495_s20 }
  0x80   : > { %v550_v23 = vadd.f32 %v549_v55, %v546_v12  ;;  %v577_v24 = vadd.f32 %v576_v7, %v573_v14  ;;  %v629_v26 = vmul.f32 %v628_v22, %v508_v13  ;;  %v649_v29 = vstv %s1497_s21 }
  0x81   : > { %v626_v28 = vadd.f32 %v625_v21, %v622_v17  ;;  %v651_v30 = vstv %s1503_s22  ;;  %v655_v31 = vstv %s1505_s23  ;;  %v592_v38 = vmul.f32 %v1391_v36, %v591_v10 }
  0x82   : > { %v551_v32 = vmax.f32 %v550_v23, 0.0  ;;  %v581_v33 = vadd.f32 %v580_v62, %v577_v24  ;;  %v652_v34 = vmul.f32 %v651_v30, %v1487_v1  ;;  %v656_v37 = vmul.f32 %v655_v31, %v508_v13 }
  0x83   : > { %v604_v39 = vadd.f32 %v603_v20, %v600_v19  ;;  %v659_v40 = vstv %s1512_s28  ;;  %v630_v42 = vadd.f32 %v629_v26, %v626_v28  ;;  %v676_v44 = vstv %s1515_s29 }
  0x84   : > { %v585_v41 = vadd.f32 %v584_v8, %v581_v33  ;;  %v653_v43 = vadd.f32 %v652_v34, %v649_v29  ;;  %v607_v45 = vmul.f32 %v606_v15, %v551_v32  ;;  %v633_v46 = vmul.f32 %v632_v27, %v551_v32 }
  0x85   : > { %v678_v47 = vstv %s1521_s8  ;;  %v682_v48 = vstv %s1523_s12  ;;  %v660_v50 = vmul.f32 %v659_v40, %v551_v32  ;;  %v686_v51 = vstv %s1527_s27 }
  0x86   : > { %v589_v49 = vadd.f32 %v588_v9, %v585_v41  ;;  %v657_v2 = vadd.f32 %v656_v37, %v653_v43  ;;  %v679_v52 = vmul.f32 %v678_v47, %v1487_v1  ;;  %v683_v53 = vmul.f32 %v682_v48, %v508_v13 }
  0x87   : > { %v610_v54 = vstv %s1531_s30  ;;  %v636_v55 = vstv %s1534_s10  ;;  %v663_v56 = vstv %s1539_s15  ;;  %v687_v57 = vmul.f32 %v686_v51, %v551_v32 }
  0x88   : > { %v593_v3 = vadd.f32 %v592_v38, %v589_v49  ;;  %v680_v7 = vadd.f32 %v679_v52, %v676_v44  ;;  %v690_v58 = vstv %s1541_s16  ;;  %v608_v60 = vadd.f32 %v607_v45, %v604_v39 }
  0x89   : > { %v634_v61 = vadd.f32 %v633_v46, %v630_v42  ;;  %v661_v62 = vadd.f32 %v660_v50, %v657_v2 }
  0x8a   : > { %v594_v59 = vmax.f32 %v593_v3, 0.0  ;;  %v684_v63 = vadd.f32 %v683_v53, %v680_v7 }
  0x8c   : > { %v611_v0 = vmul.f32 %v610_v54, %v594_v59  ;;  %v637_v4 = vmul.f32 %v636_v55, %v594_v59  ;;  %v664_v16 = vmul.f32 %v663_v56, %v594_v59  ;;  %v691_v5 = vmul.f32 %v690_v58, %v594_v59 }
  0x8d   : > { %v688_v6 = vadd.f32 %v687_v57, %v684_v63 }
  0x8e   : > { %v612_v8 = vadd.f32 %v611_v0, %v608_v60  ;;  %v638_v1 = vadd.f32 %v637_v4, %v634_v61  ;;  %v665_v13 = vadd.f32 %v664_v16, %v661_v62 }
  0x8f   : > { %v692_v9 = vadd.f32 %v691_v5, %v688_v6 }
  0x90   : > { %v926_v10 = vmul.f32 -1.442695, %v612_v8  ;;  %v932_v11 = vmul.f32 -1.442695, %v638_v1  ;;  %v939_v12 = vmul.f32 -1.442695, %v665_v13 }
  0x91   : > { %v946_v14 = vmul.f32 -1.442695, %v692_v9 }
  0x92   : > { %1028 = vpow2.f32 %v926_v10 }
  0x93   : > { %1030 = vpow2.f32 %v932_v11 }
  0x94   : > { %1032 = vpow2.f32 %v939_v12 }
  0x95   : > { %1034 = vpow2.f32 %v946_v14 }
  0x9c   : > { %v1029_v15 = vpop.eup %1028 }
  0x9d   : > { %v1031_v17 = vpop.eup %1030  ;;  %v616_v19 = vadd.f32 1.0, %v1029_v15 }
  0x9e   : > { %v1033_v20 = vpop.eup %1032  ;;  %v642_v21 = vadd.f32 1.0, %v1031_v17 }
  0x9f   : > { %v1035_v22 = vpop.eup %1034  ;;  %1036 = vrcp.f32 %v616_v19  ;;  %v669_v23 = vadd.f32 1.0, %v1033_v20 }
  0xa0   : > { %1038 = vrcp.f32 %v642_v21  ;;  %v696_v24 = vadd.f32 1.0, %v1035_v22 }
  0xa1   : > { %1040 = vrcp.f32 %v669_v23 }
  0xa2   : > { %1042 = vrcp.f32 %v696_v24 }
  0xa9   : > { %v1037_v26 = vpop.eup %1036 }
  0xaa   : > { %v1039_v27 = vpop.eup %1038  ;;  %v619_v28 = vmul.f32 %v1037_v26, %v1351_v18 }
  0xab   : > { %v1041_v29 = vpop.eup %1040  ;;  %v645_v30 = vmul.f32 %v1039_v27, %v1365_v25 }
  0xac   : > { %v1043_v31 = vpop.eup %1042  ;;  %620 = vst [vmem:[%s404_s9] sm:$0x3] %v619_v28  ;;  %v672_v32 = vmul.f32 %v1041_v29, %v1388_v35 }
  0xad   : > { %933 = vst [vmem:[%s404_s9 + $0x2] sm:$0x3] %v645_v30  ;;  %v699_v33 = vmul.f32 %v1043_v31, %v1391_v36 }
  0xae   : > { %940 = vst [vmem:[%s404_s9 + $0x4] sm:$0x3] %v672_v32 }
  0xaf   : > { %947 = vst [vmem:[%s404_s9 + $0x6] sm:$0x3] %v699_v33 }
  0xb0 PF: > { %s20_s26 = sadd.s32 1, %s1153_s26   ;;  %s1594_s24 = smov %s1149_s25 }
  0xb1   : > { %p17_p8 = scmp.ge.s32.totalorder %s20_s26, 4   ;;  %s1595_s25 = smov %s1597_s14 }
  0xb3   :  { %19 = sbr.rel (!%p17_p8) target bundleno = 4 (0x4), region = 113 }
  0xba   :  { %729 = vsyncpa [#allocation3], 1 }
  0xbb   :  { %731 = vsyncpa [#allocation3 + $0x1], 1 }
  0xbc   :  { %732 = vsyncpa [#allocation5], 1 }
  0xbd   :  { %733 = vsyncpa [#allocation8], 1 }

</bundles_post_ra>
